<compile_context>
chip_gen: v7x
topology: tpu7x:2x2x1
jax: 0.10.0
libtpu: 0.0.40
codegen_flags: <defaults>
</compile_context>

<pallas_src>
import jax
import jax.numpy as jnp
from jax.experimental import pallas as pl
from jax.experimental.pallas import tpu as pltpu


def _implicit_a_kernel(x_ref, bias_ref, o_ref):
    # x_ref: (br, bc) tile of the flattened activation; bias_ref: (br, 1)
    # per-row (= per-channel) bias in the output dtype. Lane-broadcast add on
    # the VPU; the add promotes to the output dtype if x is narrower.
    o_ref[...] = x_ref[...] + bias_ref[...]


def _choose_blocks(num_rows: int, hw: int, itemsize: int,
                   target_tile_bytes: int = 4 * 1024 * 1024,
                   min_grid_steps: int = 4):
    """Pick (row_block, lane_block) giving ~target_tile_bytes, (8,128)-legal tiles."""
    cdiv = lambda a, b: -(-a // b)
    # Native sublane packing: 8 for f32, 16 for bf16, 32 for int8/fp8.
    pack = max(8, 32 // itemsize)

    # Lane block: full H*W unless even a minimal pack-row strip exceeds the
    # target (large feature maps) -- then tile H*W in multiples of 128.
    if pack * hw * itemsize > target_tile_bytes and hw > 128:
        bc = (target_tile_bytes // (pack * itemsize)) // 128 * 128
        bc = int(max(128, min(bc, hw)))
    else:
        bc = hw

    # Row block toward the tile target at the chosen lane width.
    rows = max(1, target_tile_bytes // max(1, bc * itemsize))
    if rows >= num_rows:
        br = num_rows                     # full extent: always a legal block dim
    else:
        br = min(num_rows, max(pack, (rows // pack) * pack))

    # Megacore: ensure >= min_grid_steps grid steps when the array allows it,
    # so v7x's two TensorCores both get blocks (grid=1 would idle one core).
    def steps(br_, bc_):
        return cdiv(num_rows, br_) * cdiv(hw, bc_)

    while steps(br, bc) < min_grid_steps and br > pack:
        br = max(pack, ((br // 2) // pack) * pack)

    return br, bc


def implicit_a(x: jax.Array, implicit: jax.Array) -> jax.Array:
    """Forward of ImplicitA: return implicit + x (broadcast over N, H, W)."""
    N, C, H, W = x.shape
    assert implicit.shape == (1, C, 1, 1)

    # Match PyTorch type promotion (f32 param + bf16 x -> f32 output).
    out_dtype = jnp.promote_types(x.dtype, implicit.dtype)

    R, HW = N * C, H * W
    # Lane-dense layout: flatten spatial dims so the last (lane) dim is wide
    # and stores are full-width vst, not narrow masked vst.msk.
    # TODO(synk): for odd heads (e.g. 13x13 = 169) the tail vreg of each row
    # is still a masked store; those heads are better served by fusing the add
    # into the neighboring conv.
    x2 = x.reshape(R, HW)
    # One bias scalar per flattened row (row r -> channel r % C), pre-cast to
    # the output dtype so the in-kernel add is the only promotion point.
    bias = jnp.broadcast_to(
        implicit.reshape(1, C).astype(out_dtype), (N, C)
    ).reshape(R, 1)

    itemsize = x2.dtype.itemsize
    br, bc = _choose_blocks(R, HW, itemsize)
    grid = (pl.cdiv(R, br), pl.cdiv(HW, bc))

    out_itemsize = jnp.dtype(out_dtype).itemsize
    cost = pl.CostEstimate(
        flops=R * HW,
        transcendentals=0,
        bytes_accessed=R * HW * (itemsize + out_itemsize) + R * out_itemsize,
    )

    out2 = pl.pallas_call(
        _implicit_a_kernel,
        out_shape=jax.ShapeDtypeStruct((R, HW), out_dtype),
        grid_spec=pltpu.PrefetchScalarGridSpec(
            num_scalar_prefetch=0,
            grid=grid,
            in_specs=[
                pl.BlockSpec((br, bc), lambda i, j: (i, j)),
                # Bias index ignores the inner lane axis -> Pallas only
                # re-DMAs this tiny block when the row-block index changes.
                pl.BlockSpec((br, 1), lambda i, j: (i, 0)),
            ],
            out_specs=pl.BlockSpec((br, bc), lambda i, j: (i, j)),
        ),
        compiler_params=pltpu.CompilerParams(
            # Both axes independent; parallel lets v7x's 2 TCs split the grid.
            dimension_semantics=("parallel", "parallel"),
            # ~4 MiB tiles, double-buffered in+out (+ tiny bias) fits with
            # headroom under v7x's 64 MiB physical VMEM; trivially fine on
            # v5e/v6e (128 MiB) and above v5e's 16 MiB scoped default.
            vmem_limit_bytes=48 * 1024 * 1024,
        ),
        cost_estimate=cost,
    )(x2, bias)

    return out2.reshape(N, C, H, W)


if __name__ == "__main__":
    # Shapes consistent with the module: NCHW input, channel = 4.
    N, C, H, W = 2, 4, 16, 16
    mean, std = 0.0, 0.02

    key = jax.random.PRNGKey(0)
    k_param, k_x = jax.random.split(key)

    # Deterministic parameter init matching nn.init.normal_(mean=0.0, std=0.02)
    implicit = mean + std * jax.random.normal(k_param, (1, C, 1, 1), dtype=jnp.float32)
    x = jax.random.normal(k_x, (N, C, H, W), dtype=jnp.float32)

    out = jax.block_until_ready(implicit_a(x, implicit))

    # Correctness check against plain-JAX broadcast add.
    ref = implicit + x
    assert out.shape == (N, C, H, W)
    assert out.dtype == ref.dtype
    assert jnp.allclose(out, ref, atol=1e-6, rtol=1e-6)

    print("KERNEL_OK")
</pallas_src>

<mosaic_0001>
module attributes {stable_mosaic.version = 11 : i64} {
  func.func @_implicit_a_kernel(%arg0: i32, %arg1: i32, %arg2: memref<8x256xf32, #tpu.memory_space<vmem>>, %arg3: memref<8x1xf32, #tpu.memory_space<vmem>>, %arg4: memref<8x256xf32, #tpu.memory_space<vmem>>) attributes {dimension_semantics = [#tpu.dimension_semantics<parallel>, #tpu.dimension_semantics<parallel>], iteration_bounds = array<i64: 1, 1>, scalar_prefetch = 0 : i64, scratch_operands = 0 : i64, tpu.core_type = #tpu.core_type<tc>, window_params = [{transform_indices = @transform_0, window_bounds = array<i64: 8, 256>}, {transform_indices = @transform_1, window_bounds = array<i64: 8, 1>}, {transform_indices = @transform_2, window_bounds = array<i64: 8, 256>}]} {
    %c0 = arith.constant 0 : index
    %c0_0 = arith.constant 0 : index
    %0 = vector.load %arg2[%c0, %c0_0] : memref<8x256xf32, #tpu.memory_space<vmem>>, vector<8x256xf32>
    %c0_1 = arith.constant 0 : index
    %c0_2 = arith.constant 0 : index
    %1 = vector.load %arg3[%c0_1, %c0_2] : memref<8x1xf32, #tpu.memory_space<vmem>>, vector<8x1xf32>
    %2 = vector.broadcast %1 : vector<8x1xf32> to vector<8x256xf32>
    %3 = arith.addf %0, %2 : vector<8x256xf32>
    %c0_3 = arith.constant 0 : index
    %c0_4 = arith.constant 0 : index
    %4 = vector.load %arg4[%c0_3, %c0_4] : memref<8x256xf32, #tpu.memory_space<vmem>>, vector<8x256xf32>
    tpu.vector_store %arg4[%c0_3, %c0_4], %3 {strides = array<i32>} : memref<8x256xf32, #tpu.memory_space<vmem>>, vector<8x256xf32>,
    return
  }
  func.func @transform_0(%arg0: i32, %arg1: i32) -> (i32, i32) {
    %c0_i32 = arith.constant 0 : i32
    return %arg0, %arg1 : i32, i32
  }
  func.func @transform_1(%arg0: i32, %arg1: i32) -> (i32, i32) {
    %c0_i32 = arith.constant 0 : i32
    %c0_i32_0 = arith.constant 0 : i32
    return %arg0, %c0_i32 : i32, i32
  }
  func.func @transform_2(%arg0: i32, %arg1: i32) -> (i32, i32) {
    %c0_i32 = arith.constant 0 : i32
    return %arg0, %arg1 : i32, i32
  }
}

</mosaic_0001>

<bundles_post_ra>
// kernel: tpu_custom_call.1
= control target key start
LH: loop header
LB: loop body
LE: loop exit
PB: predicated region body
PF: predicated region fallthrough
CT: control target
= control target key end

     0   :  { %7 = vsyncpa [#allocation3], 0  ;;  %s148_s0 = inlined_call_operand.hbm [shape: f32[8,256], index: 0, kind: input, shape index: {}]   ;;  %s149_s1 = inlined_call_operand.vmem [shape: f32[8,1], index: 1, kind: input, shape index: {}]   ;;  %s150_s2 = inlined_call_operand.hbm [shape: f32[8,256], index: 2, kind: output, shape index: {}]  }
   0x1   :  { %8 = vsyncpa [#allocation4], 0  ;;  %s103_s9 = smov [#allocation2]   ;;  %s55_s13 = scalar_lea.hbm %s148_s0, 256 }
   0x2   :  { %s15_s10 = sshll.u32 %s103_s9, 4  ;;  %p56_p0 = scmp.ne.s32.totalorder %s148_s0, %s55_s13  ;;  %s16_s10 = int_to_ptr.vmem [resolvable:$true] %s15_s10 }
   0x3   :  { %p59_p1 = scmp.lt.u32.totalorder %s55_s13, %s148_s0 }
   0x5   :  { %p61_p2 = pnand %p59_p1, %p56_p0 }
   0x7   :  { %64 = shalt.err (!%p61_p2)
}
   0x8   :  { %s65_s18 = scalar_lea.vmem %s16_s10, 256  ;;  %p70_p4 = scmp.lt.s32.totalorder %s16_s10, %s16_s10 }
   0x9   :  { %p66_p3 = scmp.ne.s32.totalorder %s16_s10, %s65_s18  ;;  %p71_p5 = scmp.lt.s32.totalorder %s65_s18, %s65_s18 }
   0xb   :  { %p72_p6 = por %p71_p5, %p70_p4 }
   0xd   :  { %p73_p7 = pnand %p72_p6, %p66_p3 }
   0xf   :  { %76 = shalt.err (!%p73_p7)
}
  0x10   :  { %18 = dma.hbm_to_vmem [thread:$0]  %s148_s0, 256, %s16_s10, [#allocation3]  }
  0x11   :  { %99 = dma.done.wait [#allocation3], 256  }
  0x12   :  { %100 = vsyncadd [#allocation3], 4294967040  ;;  %v104_v0 = vmov 0   ;;  %v26_v1 = vld [vmem:[%s149_s1] sm:$0xff]  ;;  %v25_v3 = vld [vmem:[#allocation2 + $0x8] sm:$0xff]  ;;  %s105_s23 = smov [#allocation5]  }
  0x13   :  { %54 = vset.pattern.permute.xlu0 %v104_v0  ;;  %v24_v2 = vld [vmem:[#allocation2] sm:$0xff]  ;;  %s42_s24 = sshll.u32 %s105_s23, 4  ;;  %s43_s24 = int_to_ptr.vmem [resolvable:$true] %s42_s24 }
  0x14   :  { %29 = vperm.xlu0 %54, %v26_v1   ;;  %s77_s0 = scalar_lea.vmem %s43_s24, 256  ;;  %p82_p9 = scmp.lt.s32.totalorder %s43_s24, %s43_s24 }
  0x15   :  { %p78_p8 = scmp.ne.s32.totalorder %s43_s24, %s77_s0  ;;  %p83_p10 = scmp.lt.s32.totalorder %s77_s0, %s77_s0 }
  0x17   :  { %p84_p11 = por %p83_p10, %p82_p9 }
  0x19   :  { %p85_p12 = pnand %p84_p11, %p78_p8 }
  0x93   :  { %v30_v4 = vpop.permute.xlu0 %29 }
  0x94   :  { %v32_v5 = vadd.f32 %v30_v4, %v24_v2  ;;  %v33_v6 = vadd.f32 %v30_v4, %v25_v3 }
  0x96   :  { %34 = vst [vmem:[#allocation5] sm:$0xff] %v32_v5  ;;  %35 = vst [vmem:[#allocation5 + $0x8] sm:$0xff] %v33_v6 }
  0x97   :  { %88 = shalt.err (!%p85_p12)
}
  0x98   :  { %s89_s26 = scalar_lea.hbm %s150_s2, 256 }
  0x99   :  { %p90_p13 = scmp.ne.s32.totalorder %s150_s2, %s89_s26  ;;  %p93_p0 = scmp.lt.u32.totalorder %s89_s26, %s150_s2 }
  0x9b   :  { %p95_p1 = pnand %p93_p0, %p90_p13 }
  0x9d   :  { %98 = shalt.err (!%p95_p1)
}
  0x9e   :  { %45 = dma.vmem_to_hbm [thread:$0]  %s43_s24, 256, %s150_s2, [#allocation4]  }
  0x9f   :  { %101 = dma.done.wait [#allocation4], 256  }
  0xa0   :  { %102 = vsyncadd [#allocation4], 4294967040 }
  0xa1   :  { %49 = vsyncpa [#allocation3], 1 }
  0xa2   :  { %50 = vsyncpa [#allocation4], 1 }

</bundles_post_ra>
